<compile_context>
chip_gen: v6e
topology: v6e:2x2x1
jax: 0.10.0
libtpu: 0.0.40
codegen_flags: <defaults>
</compile_context>

<pallas_src>
import jax
import jax.numpy as jnp
from jax.experimental import pallas as pl
from jax.experimental.pallas import tpu as pltpu

# ---- module hyper-parameters (match LASympNet(dim, layers=3, sublayers=2)) ----
DIM = 16              # full phase-space dim (even)
D = DIM // 2          # d = dim / 2
LAYERS = 3            # LASympNet.layers  -> (LAYERS-1) Lin+Act pairs + LinMout
SUBLAYERS = 2         # LinearModule.layers
NB = 3 * LAYERS - 1   # packed bias/scale columns: bp(L) + bq(L) + a(L-1)

N = 256               # demo batch (keeps a 2-step grid at TB=128)
TB = 128              # batch-lane tile: full 128-lane vregs


def lasympnet_kernel(x_ref, ssym_ref, bvec_ref, out_ref):
    """Whole LA-SympNet forward for one batch-lane tile (transposed layout).

    x_ref    : [DIM+1, TB]               ssym_ref : [LAYERS*SUBLAYERS, D, D]
    bvec_ref : [D, NB]                   out_ref  : [DIM, TB]
    """
    tb = x_ref.shape[1]
    p = x_ref[0:D, :]                         # [D, TB]  (sublane-tile aligned)
    q = x_ref[D:2 * D, :]                     # [D, TB]
    # Hoist the sublane-broadcast of h once (JAX does not CSE broadcasts).
    h = jnp.broadcast_to(x_ref[2 * D:2 * D + 1, :], (D, tb))   # [D, TB]

    def linear_module(p, q, m):
        # LinearModule.forward, transposed:  q @ Ssym  ==  (Ssym @ q^T)^T
        for j in range(SUBLAYERS):
            S = ssym_ref[m * SUBLAYERS + j]   # [D, D], already symmetric
            if j % 2 == 0:
                p = p + jnp.dot(S, q, preferred_element_type=jnp.float32) * h
            else:
                q = jnp.dot(S, p, preferred_element_type=jnp.float32) * h + q
        bp = bvec_ref[:, m:m + 1]                             # [D, 1] -> lanes
        bq = bvec_ref[:, LAYERS + m:LAYERS + m + 1]           # [D, 1]
        p = p + bp * h
        q = q + bq * h
        return p, q

    # (LAYERS - 1) x (LinearModule -> ActivationModule), alternating up/low
    for i in range(LAYERS - 1):
        p, q = linear_module(p, q, i)
        a = bvec_ref[:, 2 * LAYERS + i:2 * LAYERS + i + 1]    # [D, 1]
        if i % 2 == 0:                        # mode 'up'  (EUP sigmoid)
            p = p + jax.nn.sigmoid(q) * a * h
        else:                                 # mode 'low'
            q = jax.nn.sigmoid(p) * a * h + q

    # final LinMout
    p, q = linear_module(p, q, LAYERS - 1)

    # Lane-dense, sublane-aligned full-width stores (no masked vst).
    out_ref[0:D, :] = p
    out_ref[D:, :] = q


def lasympnet_forward(pqh, ssym, bp, bq, a):
    """Wrapper.  pqh: [num, dim] or [num, dim+1]  ->  [num, dim] (= cat(p, q))."""
    n, last = pqh.shape
    if last == DIM + 1:
        x = pqh
    elif last == DIM:
        x = jnp.concatenate([pqh, jnp.ones((n, 1), pqh.dtype)], axis=-1)
    else:
        raise ValueError("last dim must be dim or dim+1")

    # One wrapper-side transpose presents a lane-dense [feature, batch] slab
    # to the kernel (layout plumbing only, replaces the three p/q/h slices).
    xT = jnp.transpose(x)                                      # [DIM+1, N]

    ssym_flat = ssym.reshape(LAYERS * SUBLAYERS, D, D)
    # Fuse all vector params into one tiny resident block of [D, 1] columns.
    bvec = jnp.concatenate(
        [bp.reshape(LAYERS, D).T,          # cols 0 .. L-1        : bp_m
         bq.reshape(LAYERS, D).T,          # cols L .. 2L-1       : bq_m
         a.reshape(LAYERS - 1, D).T],      # cols 2L .. 2L+L-2    : a_i
        axis=1)                                                 # [D, NB]

    tb = TB if n >= TB else n              # full 128 lanes when possible
    grid = (pl.cdiv(n, tb),)
    # NOTE: if n % tb != 0, the padded lanes of the last tile compute on
    # garbage; Pallas clips the output store so the result is unaffected.

    outT = pl.pallas_call(
        lasympnet_kernel,
        out_shape=jax.ShapeDtypeStruct((DIM, n), jnp.float32),
        grid_spec=pltpu.PrefetchScalarGridSpec(
            num_scalar_prefetch=0,
            grid=grid,
            in_specs=[
                pl.BlockSpec((DIM + 1, tb), lambda i: (0, i)),                 # x (p|q|h)
                pl.BlockSpec((LAYERS * SUBLAYERS, D, D), lambda i: (0, 0, 0)),  # S+S^T
                pl.BlockSpec((D, NB), lambda i: (0, 0)),                        # bp|bq|a
            ],
            out_specs=pl.BlockSpec((DIM, tb), lambda i: (0, i)),
        ),
        compiler_params=pltpu.CompilerParams(dimension_semantics=("parallel",)),
    )(xT, ssym_flat, bvec)

    return jnp.transpose(outT)             # back to [num, dim] = cat(p, q)


def lasympnet_reference(pqh, ssym, bp, bq, a):
    """Pure-JAX reference mirroring the PyTorch forward (for verification)."""
    p, q, h = pqh[:, :D], pqh[:, D:DIM], pqh[:, DIM:]

    def linm(p, q, m):
        for j in range(SUBLAYERS):
            S = ssym[m, j]
            if j % 2 == 0:
                p = p + q @ S * h
            else:
                q = p @ S * h + q
        return p + bp[m] * h, q + bq[m] * h

    for i in range(LAYERS - 1):
        p, q = linm(p, q, i)
        if i % 2 == 0:
            p = p + jax.nn.sigmoid(q) * a[i] * h
        else:
            q = jax.nn.sigmoid(p) * a[i] * h + q
    p, q = linm(p, q, LAYERS - 1)
    return jnp.concatenate([p, q], axis=-1)


if __name__ == "__main__":
    key = jax.random.PRNGKey(0)
    k_s, k_a, k_bp, k_bq, k_x = jax.random.split(key, 5)

    # Parameters matching the module's shapes.  S_i ~ N(0, 0.01^2), a ~ N(0, 0.01^2).
    # bp/bq are initialized to zero in the module; here we use small nonzero
    # values so the bias path of the kernel is actually exercised by the check.
    s_raw = jax.random.normal(k_s, (LAYERS, SUBLAYERS, D, D), jnp.float32) * 0.01
    ssym = s_raw + jnp.swapaxes(s_raw, -1, -2)     # precompute S + S^T (param glue)
    bp = jax.random.normal(k_bp, (LAYERS, 1, D), jnp.float32) * 0.01
    bq = jax.random.normal(k_bq, (LAYERS, 1, D), jnp.float32) * 0.01
    a = jax.random.normal(k_a, (LAYERS - 1, 1, D), jnp.float32) * 0.01

    # Input [num, dim + 1]: (p, q, h) packed on the last axis.
    pqh = jax.random.normal(k_x, (N, DIM + 1), jnp.float32)

    out = lasympnet_forward(pqh, ssym, bp, bq, a)
    out = jax.block_until_ready(out)

    ref = lasympnet_reference(pqh, ssym, bp, bq, a)
    assert out.shape == (N, DIM)
    assert jnp.allclose(out, ref, atol=1e-5, rtol=1e-5), "mismatch vs. reference"

    print("KERNEL_OK")
</pallas_src>

<mosaic_0001>
module attributes {stable_mosaic.version = 11 : i64} {
  func.func @lasympnet_kernel(%arg0: i32, %arg1: memref<17x128xf32, #tpu.memory_space<vmem>>, %arg2: memref<6x8x8xf32, #tpu.memory_space<vmem>>, %arg3: memref<8x8xf32, #tpu.memory_space<vmem>>, %arg4: memref<16x128xf32, #tpu.memory_space<vmem>>) attributes {dimension_semantics = [#tpu.dimension_semantics<parallel>], iteration_bounds = array<i64: 2>, scalar_prefetch = 0 : i64, scratch_operands = 0 : i64, tpu.core_type = #tpu.core_type<tc>, window_params = [{transform_indices = @transform_0, window_bounds = array<i64: 17, 128>}, {pipeline_mode = #tpu.pipeline_mode<synchronous>, transform_indices = @transform_1, window_bounds = array<i64: 6, 8, 8>}, {pipeline_mode = #tpu.pipeline_mode<synchronous>, transform_indices = @transform_2, window_bounds = array<i64: 8, 8>}, {transform_indices = @transform_3, window_bounds = array<i64: 16, 128>}]} {
    %c0 = arith.constant 0 : index
    %c0_0 = arith.constant 0 : index
    %0 = vector.load %arg1[%c0, %c0_0] : memref<17x128xf32, #tpu.memory_space<vmem>>, vector<8x128xf32>
    %c8 = arith.constant 8 : index
    %c0_1 = arith.constant 0 : index
    %1 = vector.load %arg1[%c8, %c0_1] : memref<17x128xf32, #tpu.memory_space<vmem>>, vector<8x128xf32>
    %c16 = arith.constant 16 : index
    %c0_2 = arith.constant 0 : index
    %2 = vector.load %arg1[%c16, %c0_2] : memref<17x128xf32, #tpu.memory_space<vmem>>, vector<1x128xf32>
    %3 = vector.shape_cast %2 : vector<1x128xf32> to vector<1x128xf32>
    %4 = vector.broadcast %3 : vector<1x128xf32> to vector<8x128xf32>
    %c0_3 = arith.constant 0 : index
    %c0_4 = arith.constant 0 : index
    %c0_5 = arith.constant 0 : index
    %5 = vector.load %arg2[%c0_3, %c0_4, %c0_5] : memref<6x8x8xf32, #tpu.memory_space<vmem>>, vector<1x8x8xf32>
    %6 = vector.shape_cast %5 : vector<1x8x8xf32> to vector<8x8xf32>
    %cst = arith.constant dense<0.000000e+00> : vector<8x128xf32>
    %7 = tpu.matmul %6, %1, %cst {dimension_numbers = #tpu.dot_dimension_numbers<[1], [0], [0], [1], [0, 0, 1, 1], [], []>} : vector<8x8xf32>, vector<8x128xf32>, vector<8x128xf32> -> vector<8x128xf32>
    %8 = arith.mulf %7, %4 : vector<8x128xf32>
    %9 = arith.addf %0, %8 : vector<8x128xf32>
    %c1 = arith.constant 1 : index
    %c0_6 = arith.constant 0 : index
    %c0_7 = arith.constant 0 : index
    %10 = vector.load %arg2[%c1, %c0_6, %c0_7] : memref<6x8x8xf32, #tpu.memory_space<vmem>>, vector<1x8x8xf32>
    %11 = vector.shape_cast %10 : vector<1x8x8xf32> to vector<8x8xf32>
    %cst_8 = arith.constant dense<0.000000e+00> : vector<8x128xf32>
    %12 = tpu.matmul %11, %9, %cst_8 {dimension_numbers = #tpu.dot_dimension_numbers<[1], [0], [0], [1], [0, 0, 1, 1], [], []>} : vector<8x8xf32>, vector<8x128xf32>, vector<8x128xf32> -> vector<8x128xf32>
    %13 = arith.mulf %12, %4 : vector<8x128xf32>
    %14 = arith.addf %13, %1 : vector<8x128xf32>
    %c0_9 = arith.constant 0 : index
    %c0_10 = arith.constant 0 : index
    %15 = vector.load %arg3[%c0_9, %c0_10] : memref<8x8xf32, #tpu.memory_space<vmem>>, vector<8x1xf32>
    %c0_11 = arith.constant 0 : index
    %c3 = arith.constant 3 : index
    %16 = vector.load %arg3[%c0_11, %c3] : memref<8x8xf32, #tpu.memory_space<vmem>>, vector<8x1xf32>
    %17 = vector.broadcast %15 : vector<8x1xf32> to vector<8x128xf32>
    %18 = arith.mulf %17, %4 : vector<8x128xf32>
    %19 = arith.addf %9, %18 : vector<8x128xf32>
    %20 = vector.broadcast %16 : vector<8x1xf32> to vector<8x128xf32>
    %21 = arith.mulf %20, %4 : vector<8x128xf32>
    %22 = arith.addf %14, %21 : vector<8x128xf32>
    %c0_12 = arith.constant 0 : index
    %c6 = arith.constant 6 : index
    %23 = vector.load %arg3[%c0_12, %c6] : memref<8x8xf32, #tpu.memory_space<vmem>>, vector<8x1xf32>
    %24 = arith.negf %22 : vector<8x128xf32>
    %25 = math.exp %24 : vector<8x128xf32>
    %cst_13 = arith.constant 1.000000e+00 : f32
    %26 = vector.broadcast %cst_13 : f32 to vector<8x128xf32>
    %27 = arith.addf %26, %25 : vector<8x128xf32>
    %28 = arith.divf %26, %27 : vector<8x128xf32>
    %29 = vector.broadcast %23 : vector<8x1xf32> to vector<8x128xf32>
    %30 = arith.mulf %28, %29 : vector<8x128xf32>
    %31 = arith.mulf %30, %4 : vector<8x128xf32>
    %32 = arith.addf %19, %31 : vector<8x128xf32>
    %c2 = arith.constant 2 : index
    %c0_14 = arith.constant 0 : index
    %c0_15 = arith.constant 0 : index
    %33 = vector.load %arg2[%c2, %c0_14, %c0_15] : memref<6x8x8xf32, #tpu.memory_space<vmem>>, vector<1x8x8xf32>
    %34 = vector.shape_cast %33 : vector<1x8x8xf32> to vector<8x8xf32>
    %cst_16 = arith.constant dense<0.000000e+00> : vector<8x128xf32>
    %35 = tpu.matmul %34, %22, %cst_16 {dimension_numbers = #tpu.dot_dimension_numbers<[1], [0], [0], [1], [0, 0, 1, 1], [], []>} : vector<8x8xf32>, vector<8x128xf32>, vector<8x128xf32> -> vector<8x128xf32>
    %36 = arith.mulf %35, %4 : vector<8x128xf32>
    %37 = arith.addf %32, %36 : vector<8x128xf32>
    %c3_17 = arith.constant 3 : index
    %c0_18 = arith.constant 0 : index
    %c0_19 = arith.constant 0 : index
    %38 = vector.load %arg2[%c3_17, %c0_18, %c0_19] : memref<6x8x8xf32, #tpu.memory_space<vmem>>, vector<1x8x8xf32>
    %39 = vector.shape_cast %38 : vector<1x8x8xf32> to vector<8x8xf32>
    %cst_20 = arith.constant dense<0.000000e+00> : vector<8x128xf32>
    %40 = tpu.matmul %39, %37, %cst_20 {dimension_numbers = #tpu.dot_dimension_numbers<[1], [0], [0], [1], [0, 0, 1, 1], [], []>} : vector<8x8xf32>, vector<8x128xf32>, vector<8x128xf32> -> vector<8x128xf32>
    %41 = arith.mulf %40, %4 : vector<8x128xf32>
    %42 = arith.addf %41, %22 : vector<8x128xf32>
    %c0_21 = arith.constant 0 : index
    %c1_22 = arith.constant 1 : index
    %43 = vector.load %arg3[%c0_21, %c1_22] : memref<8x8xf32, #tpu.memory_space<vmem>>, vector<8x1xf32>
    %c0_23 = arith.constant 0 : index
    %c4 = arith.constant 4 : index
    %44 = vector.load %arg3[%c0_23, %c4] : memref<8x8xf32, #tpu.memory_space<vmem>>, vector<8x1xf32>
    %45 = vector.broadcast %43 : vector<8x1xf32> to vector<8x128xf32>
    %46 = arith.mulf %45, %4 : vector<8x128xf32>
    %47 = arith.addf %37, %46 : vector<8x128xf32>
    %48 = vector.broadcast %44 : vector<8x1xf32> to vector<8x128xf32>
    %49 = arith.mulf %48, %4 : vector<8x128xf32>
    %50 = arith.addf %42, %49 : vector<8x128xf32>
    %c0_24 = arith.constant 0 : index
    %c7 = arith.constant 7 : index
    %51 = vector.load %arg3[%c0_24, %c7] : memref<8x8xf32, #tpu.memory_space<vmem>>, vector<8x1xf32>
    %52 = arith.negf %47 : vector<8x128xf32>
    %53 = math.exp %52 : vector<8x128xf32>
    %cst_25 = arith.constant 1.000000e+00 : f32
    %54 = vector.broadcast %cst_25 : f32 to vector<8x128xf32>
    %55 = arith.addf %54, %53 : vector<8x128xf32>
    %56 = arith.divf %54, %55 : vector<8x128xf32>
    %57 = vector.broadcast %51 : vector<8x1xf32> to vector<8x128xf32>
    %58 = arith.mulf %56, %57 : vector<8x128xf32>
    %59 = arith.mulf %58, %4 : vector<8x128xf32>
    %60 = arith.addf %59, %50 : vector<8x128xf32>
    %c4_26 = arith.constant 4 : index
    %c0_27 = arith.constant 0 : index
    %c0_28 = arith.constant 0 : index
    %61 = vector.load %arg2[%c4_26, %c0_27, %c0_28] : memref<6x8x8xf32, #tpu.memory_space<vmem>>, vector<1x8x8xf32>
    %62 = vector.shape_cast %61 : vector<1x8x8xf32> to vector<8x8xf32>
    %cst_29 = arith.constant dense<0.000000e+00> : vector<8x128xf32>
    %63 = tpu.matmul %62, %60, %cst_29 {dimension_numbers = #tpu.dot_dimension_numbers<[1], [0], [0], [1], [0, 0, 1, 1], [], []>} : vector<8x8xf32>, vector<8x128xf32>, vector<8x128xf32> -> vector<8x128xf32>
    %64 = arith.mulf %63, %4 : vector<8x128xf32>
    %65 = arith.addf %47, %64 : vector<8x128xf32>
    %c5 = arith.constant 5 : index
    %c0_30 = arith.constant 0 : index
    %c0_31 = arith.constant 0 : index
    %66 = vector.load %arg2[%c5, %c0_30, %c0_31] : memref<6x8x8xf32, #tpu.memory_space<vmem>>, vector<1x8x8xf32>
    %67 = vector.shape_cast %66 : vector<1x8x8xf32> to vector<8x8xf32>
    %cst_32 = arith.constant dense<0.000000e+00> : vector<8x128xf32>
    %68 = tpu.matmul %67, %65, %cst_32 {dimension_numbers = #tpu.dot_dimension_numbers<[1], [0], [0], [1], [0, 0, 1, 1], [], []>} : vector<8x8xf32>, vector<8x128xf32>, vector<8x128xf32> -> vector<8x128xf32>
    %69 = arith.mulf %68, %4 : vector<8x128xf32>
    %70 = arith.addf %69, %60 : vector<8x128xf32>
    %c0_33 = arith.constant 0 : index
    %c2_34 = arith.constant 2 : index
    %71 = vector.load %arg3[%c0_33, %c2_34] : memref<8x8xf32, #tpu.memory_space<vmem>>, vector<8x1xf32>
    %c0_35 = arith.constant 0 : index
    %c5_36 = arith.constant 5 : index
    %72 = vector.load %arg3[%c0_35, %c5_36] : memref<8x8xf32, #tpu.memory_space<vmem>>, vector<8x1xf32>
    %73 = vector.broadcast %71 : vector<8x1xf32> to vector<8x128xf32>
    %74 = arith.mulf %73, %4 : vector<8x128xf32>
    %75 = arith.addf %65, %74 : vector<8x128xf32>
    %76 = vector.broadcast %72 : vector<8x1xf32> to vector<8x128xf32>
    %77 = arith.mulf %76, %4 : vector<8x128xf32>
    %78 = arith.addf %70, %77 : vector<8x128xf32>
    %c0_37 = arith.constant 0 : index
    %c0_38 = arith.constant 0 : index
    %79 = vector.load %arg4[%c0_37, %c0_38] : memref<16x128xf32, #tpu.memory_space<vmem>>, vector<8x128xf32>
    tpu.vector_store %arg4[%c0_37, %c0_38], %75 {strides = array<i32>} : memref<16x128xf32, #tpu.memory_space<vmem>>, vector<8x128xf32>,
    %c8_39 = arith.constant 8 : index
    %c0_40 = arith.constant 0 : index
    %80 = vector.load %arg4[%c8_39, %c0_40] : memref<16x128xf32, #tpu.memory_space<vmem>>, vector<8x128xf32>
    tpu.vector_store %arg4[%c8_39, %c0_40], %78 {strides = array<i32>} : memref<16x128xf32, #tpu.memory_space<vmem>>, vector<8x128xf32>,
    return
  }
  func.func @transform_0(%arg0: i32) -> (i32, i32) {
    %c0_i32 = arith.constant 0 : i32
    %c0_i32_0 = arith.constant 0 : i32
    return %c0_i32, %arg0 : i32, i32
  }
  func.func @transform_1(%arg0: i32) -> (i32, i32, i32) {
    %c0_i32 = arith.constant 0 : i32
    %c0_i32_0 = arith.constant 0 : i32
    %c0_i32_1 = arith.constant 0 : i32
    %c0_i32_2 = arith.constant 0 : i32
    return %c0_i32, %c0_i32_0, %c0_i32_1 : i32, i32, i32
  }
  func.func @transform_2(%arg0: i32) -> (i32, i32) {
    %c0_i32 = arith.constant 0 : i32
    %c0_i32_0 = arith.constant 0 : i32
    %c0_i32_1 = arith.constant 0 : i32
    return %c0_i32, %c0_i32_0 : i32, i32
  }
  func.func @transform_3(%arg0: i32) -> (i32, i32) {
    %c0_i32 = arith.constant 0 : i32
    %c0_i32_0 = arith.constant 0 : i32
    return %c0_i32, %arg0 : i32, i32
  }
}

</mosaic_0001>

<bundles_post_ra>
// kernel: tpu_custom_call.1
= control target key start
LH: loop header
LB: loop body
LE: loop exit
PB: predicated region body
PF: predicated region fallthrough
CT: control target
= control target key end

     0   :  { %8 = vsyncpa [#allocation3], 0  ;;  %s1462_s0 = inlined_call_operand.hbm [shape: f32[17,256], index: 0, kind: input, shape index: {}]   ;;  %s1463_s1 = inlined_call_operand.hbm [shape: f32[6,8,8], index: 1, kind: input, shape index: {}]   ;;  %s1464_s2 = inlined_call_operand.hbm [shape: f32[8,8], index: 2, kind: input, shape index: {}]   ;;  %s1465_s3 = inlined_call_operand.hbm [shape: f32[16,256], index: 3, kind: output, shape index: {}]  }
   0x1   :  { %10 = vsyncpa [#allocation3 + $0x1], 0 }
   0x2   :  { %11 = vsyncpa [#allocation6], 0 }
   0x3   :  { %12 = vsyncpa [#allocation4], 0 }
   0x4   :  { %14 = vsyncpa [#allocation4 + $0x1], 0  ;;  %s1212_s12 = smov 0   ;;  %s1214_s13 = smov 0  }
   0x5   :  { %s1216_s14 = smov 0   ;;  %s1218_s15 = smov 0  }
   0x6 LB: > { %s1233_s16 = sadd.s32 4294967295, %s1170_s15   ;;  %s855_s17 = sadd.s32 4294967294, %s1170_s15   ;;  %s1170_s15 = sphi %s1218_s15, %s1487_s15   ;;  %s1166_s14 = sphi %s1216_s14, %s1486_s14   ;;  %s1162_s13 = sphi %s1214_s13, %s1485_s13   ;;  %s1158_s12 = sphi %s1212_s12, %s1484_s12  }
   0x7   : > { %s1237_s18 = sadd.s32 1, %s1170_s15   ;;  %s27_s19 = sadd.s32 1, %s1166_s14 }
   0x8   : > { %s24_s20 = ssub.s32 %s1170_s15, %s1237_s18  ;;  %p34_p0 = scmp.ne.s32.totalorder %s1166_s14, %s1162_s13 }
   0x9   : > { %p25_p1 = scmp.eq.s32.totalorder %s24_s20, 0  ;;  %p35_p2 = scmp.eq.s32.totalorder %s1170_s15, 0 }
   0xa   : > { %p40_p3 = scmp.ne.s32.totalorder %s1162_s13, %s1158_s12  ;;  %p1467_p4 = scmp.eq.s32.totalorder %s1233_s16, 0 }
   0xb   : > { %s1249_s21 = scalar_select %p25_p1, %s1166_s14, %s27_s19  }
   0xc   : > { %p1251_p5 = por %p35_p2, %p34_p0  ;;  %p1257_p6 = por %p1467_p4, %p40_p3 }
   0xd   : > { %p106_p7 = scmp.eq.s32.totalorder %s1233_s16, 1  ;;  %p112_p8 = scmp.eq.s32.totalorder %s855_s17, 1 }
   0xe   : > { %s1471_s23 = scalar_select %p1257_p6, 1, 0 }
   0xf   : > { %p856_p9 = scmp.ge.s32.totalorder %s1170_s15, 1  ;;  %p119_p10 = scmp.lt.s32.totalorder %s1170_s15, 3 }
  0x10   : > { %p1264_p11 = por %p106_p7, %p34_p0  ;;  %p1268_p12 = por %p112_p8, %p40_p3 }
  0x11   : > { %p1272_p13 = pnand %p856_p9, %p119_p10  ;;  %s1172_s27 = smov [#allocation5]  }
  0x12   : > { %s1472_s24 = scalar_select %p1264_p11, 1, 0 }
  0x13   : > { %s1473_s25 = scalar_select %p1268_p12, 1, 0 }
  0x14   : > { %s1474_s26 = scalar_select %p1272_p13, 1, 0 }
  0x15   : > { %p934_p1 = pneg %p1272_p13  ;;  %s131_s28 = sshll.u32 %s1172_s27, 4  ;;  %s132_s28 = int_to_ptr.vmem [resolvable:$true] %s131_s28 }
  0x16   : > { %p951_p3 = scmp.lt.s32.totalorder %s1170_s15, 2  ;;  %s1173_s30 = smov [#allocation7]  }
  0x17   : > { %p1280_p2 = pnand %p934_p1, %p1467_p4  ;;  %s145_s4 = sshll.u32 %s1173_s30, 4  ;;  %s146_s4 = int_to_ptr.vmem [resolvable:$true] %s145_s4 }
  0x18   : > { %s1033_s5 = scalar_lea.vmem %s132_s28, 768  ;;  %p1041_p12 = scmp.lt.s32.totalorder %s132_s28, %s132_s28 }
  0x19   : > { %p1024_p7 = pneg %p1280_p2  ;;  %p1034_p8 = scmp.ne.s32.totalorder %s132_s28, %s1033_s5 }
  0x1a   : > { %p1042_p11 = scmp.lt.s32.totalorder %s1033_s5, %s1033_s5 }
  0x1b   : > { %p1036_p9 = pnand %p1034_p8, %p1024_p7 }
  0x1c   : > { %p1043_p1 = por %p1042_p11, %p1041_p12 }
  0x1d   : > { %p1037_p10 = pneg %p1036_p9 }
  0x1f   : > { %p1044_p4 = pnand %p1043_p1, %p1037_p10 }
  0x21   : > { %1047 = shalt.err (!%p1044_p4)
}
  0x22   : > { %s1174_s6 = smov 128   ;;  %s1175_s7 = smov 8  }
  0x23   : > { %937 = dma.hbm_to_vmem [thread:$0]  (!%p1280_p2), %s1463_s1, 768, %s132_s28, [#allocation6], %s1174_s6, %s1174_s6, %s1175_s7  }
  0x24   : > { %p1303_p8 = pnand %p951_p3, %p1251_p5  ;;  %s1059_s11 = scalar_lea.vmem %s146_s4, 128 }
  0x25   : > { %p1060_p4 = scmp.ne.s32.totalorder %s146_s4, %s1059_s11  ;;  %p1067_p9 = scmp.lt.s32.totalorder %s146_s4, %s146_s4 }
  0x26   : > { %p1068_p10 = scmp.lt.s32.totalorder %s1059_s11, %s1059_s11 }
  0x27   : > { %p1062_p11 = pnand %p1060_p4, %p1024_p7 }
  0x28   : > { %p1069_p1 = por %p1068_p10, %p1067_p9 }
  0x29   : > { %p1063_p12 = pneg %p1062_p11 }
  0x2b   : > { %p1070_p0 = pnand %p1069_p1, %p1063_p12 }
  0x2d   : > { %1073 = shalt.err (!%p1070_p0)
}
  0x2e   : > { %940 = dma.hbm_to_vmem [thread:$0]  (!%p1280_p2), %s1464_s2, 128, %s146_s4, [#allocation6]  }
  0x2f   : > { %s156_s20 = sand.u32 1, %s1166_s14   ;;  %s860_s27 = sshll.u32 %s1170_s15, 7 }
  0x30   : > { %s920_s22 = smul.u32 24, %s156_s20  ;;  %s1320_s5 = scalar_lea.hbm %s1462_s0, %s860_s27 }
  0x31   : > { %s1324_s9 = scalar_lea.sflag [#allocation3], %s156_s20  ;;  %s1074_s11 = scalar_lea.hbm %s1320_s5, 384 }
  0x32   : > { %s160_s8 = scalar_lea.vmem [#allocation2], %s920_s22  ;;  %p1075_p5 = scmp.ne.s32.totalorder %s1320_s5, %s1074_s11 }
  0x33   : > { %s166_s29 = sshll.u32 %s160_s8, 4  ;;  %p1076_p2 = pneg %p1303_p8  ;;  %s1322_s29 = int_to_ptr.vmem [resolvable:$true] %s166_s29 }
  0x34   : > { %s1079_s19 = scalar_lea.hbm %s1462_s0, 768  ;;  %p1080_p7 = scmp.lt.s32.totalorder %s1320_s5, %s1462_s0 }
  0x35   : > { %p1077_p0 = pnand %p1076_p2, %p1075_p5  ;;  %p1081_p4 = scmp.lt.s32.totalorder %s1079_s19, %s1074_s11 }
  0x37   : > { %p1078_p3 = pneg %p1077_p0  ;;  %p1082_p11 = por %p1081_p4, %p1080_p7 }
  0x39   : > { %p1083_p12 = pnand %p1082_p11, %p1078_p3 }
  0x3b   : > { %1086 = shalt.err (!%p1083_p12)
}
  0x3c   : > { %s1087_s20 = scalar_lea.vmem %s1322_s29, 384  ;;  %s1176_s22 = smov [#allocation2]  }
  0x3d   : > { %p1088_p9 = scmp.ne.s32.totalorder %s1322_s29, %s1087_s20  ;;  %s1092_s30 = sshll.u32 %s1176_s22, 4  ;;  %s1093_s30 = int_to_ptr.vmem [resolvable:$false] %s1092_s30 }
  0x3e   : > { %s1094_s8 = scalar_lea.vmem %s1093_s30, 768  ;;  %p1095_p5 = scmp.lt.s32.totalorder %s1322_s29, %s1093_s30 }
  0x3f   : > { %p1090_p10 = pnand %p1088_p9, %p1076_p2  ;;  %p1096_p0 = scmp.lt.s32.totalorder %s1094_s8, %s1087_s20 }
  0x41   : > { %p1091_p1 = pneg %p1090_p10  ;;  %p1097_p6 = por %p1096_p0, %p1095_p5 }
  0x43   : > { %p1098_p13 = pnand %p1097_p6, %p1091_p1 }
  0x45   : > { %1101 = shalt.err (!%p1098_p13)
}
  0x46   : > { %s1177_s11 = smov 256   ;;  %p1477_p2 = scmp.ne.s32.totalorder %s1474_s26, 0 }
  0x47   : > { %944 = dma.hbm_to_vmem [thread:$0]  (!%p1303_p8), %s1320_s5, 384, %s1322_s29, %s1324_s9, %s1177_s11, %s1174_s6, %s1175_s7  }
  0x48   : > { %178 = sbr.rel (%p1477_p2) target bundleno = 1295 (0x50f), region = 32  ;;  %s1350_s4 = sand.u32 (!%p1477_p2), 1, %s1162_s13  }
  0x49   : > { %s921_s17 = smul.u32 (!%p1477_p2), 24, %s1350_s4  ;;  %s181_s19 = scalar_lea.sflag (!%p1477_p2), [#allocation3], %s1350_s4 }
  0x4a   : > { %p1478_p6 = scmp.ne.s32.totalorder (!%p1477_p2), %s1471_s23, 0 }
  0x4b   : > { %s184_s27 = scalar_lea.vmem (!%p1477_p2), [#allocation2], %s921_s17 }
  0x4d   : > { %1145 = dma.done.wait (%p1478_p6), %s181_s19, 384  }
  0x4e   : > { %1147 = vsyncadd (%p1478_p6), %s181_s19, 4294966912  ;;  %p1479_p13 = scmp.eq.s32.totalorder %s1233_s16, 0 }
  0x50   : > { %1149 = dma.done.wait (%p1479_p13), [#allocation6], 896   ;;  %p1480_p8 = pmov %p1479_p13 }
  0x51   : > { %v1178_v0 = vmov 0.0   ;;  %vm1179_vm0 = vmmov 0   ;;  %v1180_v1 = vmov 3   ;;  %vm223_vm1 = vcmask 64512   ;;  %v216_v2 = vld [vmem:[%s184_s27 + $0x8] sm:$0xff]  ;;  %v222_v3 = vld [vmem:[#allocation5] sm:$0xff] }
  0x52   : > { %1151 = vsyncadd (%p1480_p8), [#allocation6], 4294966400  ;;  %890 = vmatprep.subr.mxu0 %v1178_v0  ;;  %892 = vmatprep.mubr.msk.f32.mxu0 %vm1179_vm0, %v1178_v0  ;;  %v1368_v4 = vld [vmem:[#allocation7] sm:$0xff]  ;;  %v1181_v5 = vmov 0   ;;  %v1182_v6 = vmov 6   ;;  %v300_v13 = vld [vmem:[#allocation5 + $0x8] sm:$0xff] }
  0x53   : > { %1005 = vset.pattern.permute.xlu0 %v1180_v1  ;;  %895 = vmatprep.subr.mxu1 %v1178_v0  ;;  %v1377_v7 = vld [vmem:[%s184_s27 + $0x10] ss:$0 sm:$0xff]  ;;  %v215_v9 = vld [vmem:[%s184_s27] sm:$0xff]  ;;  %v1183_v14 = vmov 1   ;;  %v1184_v15 = vmov 7   ;;  %v1185_v24 = vmov 4  }
  0x54   : > { %897 = vmatprep.mubr.msk.f32.mxu1 %vm1179_vm0, %v1178_v0  ;;  %891 = vmatpush3.msra.mxu0 %v216_v2  ;;  %v404_v23 = vld [vmem:[#allocation5 + $0x10] sm:$0xff]  ;;  %v481_v40 = vld [vmem:[#allocation5 + $0x18] sm:$0xff]  ;;  %v1186_v41 = vmov 2   ;;  %v583_v60 = vld [vmem:[#allocation5 + $0x20] sm:$0xff]  ;;  %v1187_v61 = vmov 5   ;;  %s864_s23 = sshll.u32 %s1350_s4, 4 }
  0x55   : > { %385 = vperm.xlu0 %1005, %v1368_v4   ;;  %893 = vmatmul.mubr.msk.f32.vlgmr.msra.gmra.mxu0 %vm223_vm1, %v222_v3  ;;  %s214_s26 = scalar_lea.vmem [#allocation8], %s864_s23  ;;  %s875_s7 = sshll.u32 %s1233_s16, 7 }
  0x56   : > { %900 = vmatprep.subr.mxu0 %v1178_v0  ;;  %902 = vmatprep.mubr.msk.f32.mxu0 %vm1179_vm0, %v1178_v0  ;;  %s763_s6 = sshll.u32 %s214_s26, 4  ;;  %s1419_s29 = scalar_lea.hbm %s1465_s3, %s875_s7  ;;  %s1414_s6 = int_to_ptr.vmem [resolvable:$true] %s763_s6 }
  0x57   : > { %1007 = vset.pattern.permute.xlu1 %v1182_v6  ;;  %s751_s9 = scalar_lea.sflag [#allocation4], %s1350_s4  ;;  %s1102_s28 = scalar_lea.vmem %s1414_s6, 256 }
  0x58   : > { %397 = vperm.xlu1 %1007, %v1368_v4   ;;  %p1103_p3 = scmp.ne.s32.totalorder %s1414_s6, %s1102_s28  ;;  %p1481_p7 = scmp.ne.s32.totalorder %s1472_s24, 0 }
  0x59   : > { %1006 = vset.pattern.permute.xlu0 %v1181_v5  ;;  %v660_v5 = vld [vmem:[#allocation5 + $0x28] sm:$0xff]  ;;  %s1188_s16 = smov [#allocation8]  }
  0x5a   : > { %379 = vperm.xlu0 %1006, %v1368_v4   ;;  %p1104_p4 = pnand %p1103_p3, %p1481_p7  ;;  %s1106_s20 = sshll.u32 %s1188_s16, 4  ;;  %s1107_s20 = int_to_ptr.vmem [resolvable:$false] %s1106_s20 }
  0x5b   : > { %s1108_s22 = scalar_lea.vmem %s1107_s20, 512  ;;  %p1109_p12 = scmp.lt.s32.totalorder %s1414_s6, %s1107_s20 }
  0x5c   : > { %1008 = vset.pattern.permute.xlu1 %v1183_v14  ;;  %p1105_p11 = pneg %p1104_p4  ;;  %p1110_p9 = scmp.lt.s32.totalorder %s1108_s22, %s1102_s28 }
  0x5d   : > { %558 = vperm.xlu1 %1008, %v1368_v4  }
  0x5e   : > { %1010 = vset.pattern.permute.xlu0 %v1184_v15  ;;  %p1111_p10 = por %p1110_p9, %p1109_p12 }
  0x5f   : > { %576 = vperm.xlu0 %1010, %v1368_v4  }
  0x60   : > { %p1112_p1 = pnand %p1111_p10, %p1105_p11 }
  0x61   : > { %1009 = vset.pattern.permute.xlu1 %v1185_v24 }
  0x62   : > { %564 = vperm.xlu1 %1009, %v1368_v4  }
  0x63   : > { %1013 = vset.pattern.permute.xlu0 %v1187_v61 }
  0x66   : > { %1011 = vset.pattern.permute.xlu1 %v1186_v41 }
  0x67   : > { %737 = vperm.xlu1 %1011, %v1368_v4  }
  0x6b   : > { %1012 = vset.pattern.permute.xlu1 %v1187_v61 }
  0x6c   : > { %743 = vperm.xlu1 %1012, %v1368_v4  }
  0xd0   : > { %v386_v16 = vpop.permute.xlu0 %385 }
  0xd1   : > { %v388_v18 = vmul.f32 %v1377_v7, %v386_v16 }
  0xd3   : > { %v398_v29 = vpop.permute.xlu1 %397 }
  0xd5   : > { %v380_v30 = vpop.permute.xlu0 %379 }
  0xd6   : > { %v382_v32 = vmul.f32 %v1377_v7, %v380_v30 }
  0xd8   : > { %v559_v42 = vpop.permute.xlu1 %558 }
  0xd9   : > { %v561_v43 = vmul.f32 %v1377_v7, %v559_v42 }
  0xda   : > { %v577_v49 = vpop.permute.xlu0 %576 }
  0xdd   : > { %v565_v50 = vpop.permute.xlu1 %564 }
  0xde   : > { %v567_v54 = vmul.f32 %v1377_v7, %v565_v50 }
  0xe2   : > { %v738_v62 = vpop.permute.xlu1 %737 }
  0xe3   : > { %v740_v1 = vmul.f32 %v1377_v7, %v738_v62 }
  0xe7   : > { %v744_v4 = vpop.permute.xlu1 %743 }
 0x115   : > { %v293_v8 = vpop.f32.mrf.mxu0 }
 0x116   : > { %v297_v10 = vmul.f32 %v1377_v7, %v293_v8 }
 0x117   : > { %v894_v11 = vpop.f32.mrf.mxu0 }
 0x118   : > { %v298_v12 = vadd.f32 %v297_v10, %v215_v9  ;;  %v746_v10 = vmul.f32 %v1377_v7, %v744_v4 }
 0x11a   : > { %896 = vmatpush3.msra.mxu1 %v298_v12  ;;  %v383_v34 = vadd.f32 %v382_v32, %v298_v12 }
 0x11b   : > { %898 = vmatmul.mubr.msk.f32.vlgmr.msra.gmra.mxu1 %vm223_vm1, %v300_v13  ;;  %905 = vmatprep.subr.mxu1 %v1178_v0 }
 0x11c   : > { %907 = vmatprep.mubr.msk.f32.mxu1 %vm1179_vm0, %v1178_v0 }
 0x1db   : > { %v370_v17 = vpop.f32.mrf.mxu1 }
 0x1dc   : > { %v374_v19 = vmul.f32 %v1377_v7, %v370_v17 }
 0x1dd   : > { %v899_v20 = vpop.f32.mrf.mxu1 }
 0x1de   : > { %v375_v21 = vadd.f32 %v374_v19, %v216_v2 }
 0x1e0   : > { %v389_v22 = vadd.f32 %v388_v18, %v375_v21 }
 0x1e2   : > { %901 = vmatpush3.msra.mxu0 %v389_v22  ;;  %v868_v25 = vmul.f32 -1.442695, %v389_v22 }
 0x1e3   : > { %903 = vmatmul.mubr.msk.f32.vlgmr.msra.gmra.mxu0 %vm223_vm1, %v404_v23  ;;  %910 = vmatprep.subr.mxu0 %v1178_v0 }
 0x1e4   : > { %912 = vmatprep.mubr.msk.f32.mxu0 %vm1179_vm0, %v1178_v0  ;;  %1014 = vpow2.f32 %v868_v25 }
 0x1f1   : > { %v1015_v26 = vpop.eup %1014 }
 0x1f2   : > { %v393_v27 = vadd.f32 1.0, %v1015_v26 }
 0x1f4   : > { %1016 = vrcp.f32 %v393_v27 }
 0x201   : > { %v1017_v28 = vpop.eup %1016 }
 0x202   : > { %v400_v31 = vmul.f32 %v1017_v28, %v398_v29 }
 0x204   : > { %v401_v33 = vmul.f32 %v1377_v7, %v400_v31 }
 0x206   : > { %v402_v36 = vadd.f32 %v401_v33, %v383_v34 }
 0x2a3   : > { %v474_v35 = vpop.f32.mrf.mxu0 }
 0x2a4   : > { %v478_v37 = vmul.f32 %v1377_v7, %v474_v35 }
 0x2a5   : > { %v904_v38 = vpop.f32.mrf.mxu0 }
 0x2a6   : > { %v479_v39 = vadd.f32 %v478_v37, %v402_v36 }
 0x2a8   : > { %906 = vmatpush3.msra.mxu1 %v479_v39  ;;  %v562_v44 = vadd.f32 %v561_v43, %v479_v39 }
 0x2a9   : > { %908 = vmatmul.mubr.msk.f32.vlgmr.msra.gmra.mxu1 %vm223_vm1, %v481_v40  ;;  %915 = vmatprep.subr.mxu1 %v1178_v0 }
 0x2aa   : > { %917 = vmatprep.mubr.msk.f32.mxu1 %vm1179_vm0, %v1178_v0  ;;  %v871_v45 = vmul.f32 -1.442695, %v562_v44 }
 0x2ac   : > { %1018 = vpow2.f32 %v871_v45 }
 0x2b9   : > { %v1019_v46 = vpop.eup %1018 }
 0x2ba   : > { %v572_v47 = vadd.f32 1.0, %v1019_v46 }
 0x2bc   : > { %1020 = vrcp.f32 %v572_v47 }
 0x2c9   : > { %v1021_v48 = vpop.eup %1020 }
 0x2ca   : > { %v579_v52 = vmul.f32 %v1021_v48, %v577_v49 }
 0x2cc   : > { %v580_v57 = vmul.f32 %v1377_v7, %v579_v52 }
 0x369   : > { %v551_v51 = vpop.f32.mrf.mxu1 }
 0x36a   : > { %v555_v53 = vmul.f32 %v1377_v7, %v551_v51 }
 0x36b   : > { %v909_v55 = vpop.f32.mrf.mxu1 }
 0x36c   : > { %v556_v56 = vadd.f32 %v555_v53, %v389_v22 }
 0x36e   : > { %v568_v58 = vadd.f32 %v567_v54, %v556_v56 }
 0x370   : > { %v581_v59 = vadd.f32 %v580_v57, %v568_v58 }
 0x372   : > { %911 = vmatpush3.msra.mxu0 %v581_v59 }
 0x373   : > { %913 = vmatmul.mubr.msk.f32.vlgmr.msra.gmra.mxu0 %vm223_vm1, %v583_v60 }
 0x433   : > { %v653_v63 = vpop.f32.mrf.mxu0 }
 0x434   : > { %v657_v0 = vmul.f32 %v1377_v7, %v653_v63 }
 0x435   : > { %v914_v2 = vpop.f32.mrf.mxu0 }
 0x436   : > { %v658_v3 = vadd.f32 %v657_v0, %v562_v44 }
 0x438   : > { %v741_v6 = vadd.f32 %v740_v1, %v658_v3  ;;  %916 = vmatpush3.msra.mxu1 %v658_v3 }
 0x439   : > { %918 = vmatmul.mubr.msk.f32.vlgmr.msra.gmra.mxu1 %vm223_vm1, %v660_v5 }
 0x43a   : > { %748 = vst [vmem:[%s214_s26] sm:$0xff] %v741_v6 }
 0x4f9   : > { %v730_v8 = vpop.f32.mrf.mxu1 }
 0x4fa   : > { %v734_v9 = vmul.f32 %v1377_v7, %v730_v8 }
 0x4fb   : > { %v919_v11 = vpop.f32.mrf.mxu1 }
 0x4fc   : > { %v735_v12 = vadd.f32 %v734_v9, %v581_v59 }
 0x4fe   : > { %v747_v13 = vadd.f32 %v746_v10, %v735_v12 }
 0x500   : > { %749 = vst [vmem:[%s214_s26 + $0x8] sm:$0xff] %v747_v13 }
 0x501   : > { %1115 = shalt.err (!%p1112_p1)
}
 0x502   : > { %s1116_s30 = scalar_lea.hbm %s1419_s29, 256  ;;  %s1120_s17 = scalar_lea.hbm %s1465_s3, 512 }
 0x503   : > { %p1117_p5 = scmp.ne.s32.totalorder %s1419_s29, %s1116_s30  ;;  %p1121_p6 = scmp.lt.s32.totalorder %s1419_s29, %s1465_s3 }
 0x504   : > { %p1122_p13 = scmp.lt.s32.totalorder %s1120_s17, %s1116_s30 }
 0x505   : > { %p1118_p0 = pnand %p1117_p5, %p1481_p7 }
 0x506   : > { %p1123_p8 = por %p1122_p13, %p1121_p6 }
 0x507   : > { %p1119_p2 = pneg %p1118_p0 }
 0x509   : > { %p1124_p3 = pnand %p1123_p8, %p1119_p2 }
 0x50b   : > { %1127 = shalt.err (!%p1124_p3)
}
 0x50c   : > { %s1189_s23 = smov 128   ;;  %s1190_s26 = smov 256  }
 0x50d   : > { %s1191_s7 = smov 8  }
 0x50e   : > { %932 = dma.vmem_to_hbm [thread:$0]  (%p1481_p7), %s1414_s6, 256, %s1419_s29, %s751_s9, %s1189_s23, %s1190_s26, %s1191_s7  }
 0x50f PF: > { %s778_s10 = sand.u32 1, %s1158_s12   ;;  %p1482_p4 = scmp.ne.s32.totalorder %s1473_s25, 0 }
 0x510   : > { %p1483_p11 = scmp.ge.s32.totalorder %s1170_s15, 2  ;;  %s779_s5 = scalar_lea.sflag [#allocation4], %s778_s10 }
 0x512   : > { %p946_p12 = pnand %p1483_p11, %p1482_p4 }
 0x514   : > { %p947_p9 = pneg %p946_p12 }
 0x516   : > { %1153 = dma.done.wait (%p947_p9), %s779_s5, 256  }
 0x517   : > { %1155 = vsyncadd (%p947_p9), %s779_s5, 4294967040  ;;  %p17_p10 = scmp.ge.s32.totalorder %s1237_s18, 4   ;;  %s1484_s12 = smov %s1162_s13 }
 0x518   : > { %s1485_s13 = smov %s1166_s14  ;;  %s1486_s14 = smov %s1249_s21 }
 0x519   : > { %s1487_s15 = smov %s1237_s18  ;;  %19 = sbr.rel (!%p17_p10) target bundleno = 6 (0x6), region = 90 }
 0x51e   :  { %784 = vsyncpa [#allocation3], 1 }
 0x51f   :  { %786 = vsyncpa [#allocation3 + $0x1], 1 }
 0x520   :  { %787 = vsyncpa [#allocation6], 1 }
 0x521   :  { %788 = vsyncpa [#allocation4], 1 }
 0x522   :  { %790 = vsyncpa [#allocation4 + $0x1], 1 }

</bundles_post_ra>
